<compile_context>
chip_gen: v5e
topology: v5e:2x2
jax: 0.10.0
libtpu: 0.0.40
codegen_flags: <defaults>
</compile_context>

<pallas_src>
import jax
import jax.numpy as jnp
from jax.experimental import pallas as pl
from jax.experimental.pallas import tpu as pltpu

IN_F = 2
HID = 10
OUT_F = 1

PACK = 12                    # samples packed per 128-lane row (12*10 = 120 <= 128)
IN_PACKED = PACK * IN_F      # 24
HID_PAD = 128                # lane-aligned packed hidden width (120 -> 128)
OUT_PACKED = PACK * OUT_F    # 12


def _cdiv(a, b):
    return -(-a // b)


def _round_up(n, m):
    return ((n + m - 1) // m) * m


def _pad2(a, rows, cols):
    r, c = a.shape
    return jnp.pad(a, ((0, rows - r), (0, cols - c)))


def _mlp_kernel(x_ref, w1_ref, b1_ref, w2_ref, b2_ref, w3_ref, b3_ref, o_ref):
    # 12-samples-per-row packed forward:
    #   relu(relu(x @ W1_bd + b1) @ W2_bd + b2) @ W3_sel + b3
    x = x_ref[...]                                                       # (TR, 24)
    h1 = jnp.dot(x, w1_ref[...], preferred_element_type=jnp.float32) + b1_ref[...]
    h1 = jnp.maximum(h1, 0.0)                                            # (TR, 128)
    h2 = jnp.dot(h1, w2_ref[...], preferred_element_type=jnp.float32) + b2_ref[...]
    h2 = jnp.maximum(h2, 0.0)                                            # (TR, 128)
    o_ref[...] = (jnp.dot(h2, w3_ref[...], preferred_element_type=jnp.float32)
                  + b3_ref[...])                                         # (TR, 12)


def _prepare_packed_params(params):
    """Build block-diagonal packed weights; zero padding is exact."""
    (w1, b1), (w2, b2), (w3, b3) = params
    eye = jnp.eye(PACK, dtype=jnp.float32)
    w1_bd = _pad2(jnp.kron(eye, w1.astype(jnp.float32)), IN_PACKED, HID_PAD)    # (24, 128)
    w2_bd = _pad2(jnp.kron(eye, w2.astype(jnp.float32)), HID_PAD, HID_PAD)      # (128, 128)
    w3_sel = _pad2(jnp.kron(eye, w3.astype(jnp.float32)), HID_PAD, OUT_PACKED)  # (128, 12)
    b1_t = _pad2(jnp.tile(b1.astype(jnp.float32), (1, PACK)), 1, HID_PAD)       # (1, 128)
    b2_t = _pad2(jnp.tile(b2.astype(jnp.float32), (1, PACK)), 1, HID_PAD)       # (1, 128)
    b3_t = jnp.tile(b3.astype(jnp.float32), (1, PACK))                          # (1, 12)
    return w1_bd, b1_t, w2_bd, b2_t, w3_sel, b3_t


def addition_network_forward(x, params, tr=2048):
    """x: [batch, 2] float32 -> [batch, 1] float32."""
    B = x.shape[0]
    w1_bd, b1_t, w2_bd, b2_t, w3_sel, b3_t = _prepare_packed_params(params)

    # --- tile geometry (in packed rows; 1 row == PACK samples) ---
    R = max(_cdiv(B, PACK), 1)          # packed rows needed
    R8 = _round_up(R, 8)                # sublane-aligned row count
    TR = min(_round_up(max(tr, 8), 8), R8)
    if R8 >= 16:                        # >=2 grid steps when possible (v7x: 2 TCs)
        TR = min(TR, _round_up(_cdiv(R8, 2), 8))
    R_pad = _round_up(R, TR)            # grid divides exactly (no boundary blocks)
    grid = (R_pad // TR,)

    # --- pack the input: (B, 2) -> (R_pad, 24); the reshape itself is free ---
    xf = x.astype(jnp.float32)
    if R_pad * PACK != B:               # pad only the (<= one tile) tail
        xf = jnp.pad(xf, ((0, R_pad * PACK - B), (0, 0)))
    x_packed = xf.reshape(R_pad, IN_PACKED)

    # Weights/biases: constant block index -> DMA'd once, resident in VMEM.
    const = lambda shape: pl.BlockSpec(shape, lambda i: (0, 0))

    # Explicit VMEM budget from block shapes (streamed blocks double-buffered,
    # h1/h2 temps are (TR, 128) f32), with 2x headroom, capped for v7x.
    weight_elems = (IN_PACKED * HID_PAD + HID_PAD * HID_PAD + HID_PAD * OUT_PACKED
                    + 2 * HID_PAD + OUT_PACKED)
    est = 4 * (2 * TR * (IN_PACKED + OUT_PACKED)
               + 2 * weight_elems
               + 3 * TR * HID_PAD)
    vmem_limit = int(min(48 * 2**20, max(16 * 2**20, 2 * est)))

    out_p = pl.pallas_call(
        _mlp_kernel,
        out_shape=jax.ShapeDtypeStruct((R_pad, OUT_PACKED), jnp.float32),
        grid=grid,
        in_specs=[
            pl.BlockSpec((TR, IN_PACKED), lambda i: (i, 0)),        # packed x streams
            const((IN_PACKED, HID_PAD)), const((1, HID_PAD)),       # W1_bd, b1
            const((HID_PAD, HID_PAD)), const((1, HID_PAD)),         # W2_bd, b2
            const((HID_PAD, OUT_PACKED)), const((1, OUT_PACKED)),   # W3_sel, b3
        ],
        out_specs=pl.BlockSpec((TR, OUT_PACKED), lambda i: (i, 0)),
        compiler_params=pltpu.CompilerParams(
            dimension_semantics=("parallel",),                      # 2-TC shard on v7x
            vmem_limit_bytes=vmem_limit),
    )(x_packed, w1_bd, b1_t, w2_bd, b2_t, w3_sel, b3_t)

    # (R_pad, 12): row r, lane j == sample r*12 + j  ->  (B, 1)
    return out_p.reshape(-1, OUT_F)[:B, :]


def init_params(key):
    """torch.nn.Linear-style init (U[-1/sqrt(fan_in), 1/sqrt(fan_in)]).
    Weights stored transposed ([in, out]) relative to torch."""
    def linear(key, fan_in, fan_out):
        kw, kb = jax.random.split(key)
        bound = 1.0 / jnp.sqrt(float(fan_in))
        w = jax.random.uniform(kw, (fan_in, fan_out), jnp.float32, -bound, bound)
        b = jax.random.uniform(kb, (1, fan_out), jnp.float32, -bound, bound)
        return w, b

    k1, k2, k3 = jax.random.split(key, 3)
    return (linear(k1, IN_F, HID), linear(k2, HID, HID), linear(k3, HID, OUT_F))


def _reference_forward(x, params):
    (w1, b1), (w2, b2), (w3, b3) = params
    h1 = jnp.maximum(x @ w1 + b1, 0.0)
    h2 = jnp.maximum(h1 @ w2 + b2, 0.0)
    return h2 @ w3 + b3


if __name__ == "__main__":
    key = jax.random.PRNGKey(0)
    kp, kx1, kx2 = jax.random.split(key, 3)
    params = init_params(kp)

    fwd = jax.jit(addition_network_forward, static_argnames=("tr",))

    # Small batch: single tile, B not a multiple of PACK (tail-pad path).
    x_small = jax.random.uniform(kx1, (8, IN_F), jnp.float32, 0.0, 10.0)
    out_small = fwd(x_small, params)
    jax.block_until_ready(out_small)
    assert out_small.shape == (8, OUT_F)
    assert jnp.allclose(out_small, _reference_forward(x_small, params),
                        atol=1e-5, rtol=1e-5)

    # Larger ragged batch with a small tile: multi-step grid, resident-weight
    # reuse, tail-row padding/slicing, 2-way parallel batch axis.
    x_big = jax.random.uniform(kx2, (200, IN_F), jnp.float32, 0.0, 10.0)
    out_big = fwd(x_big, params, tr=16)
    jax.block_until_ready(out_big)
    assert out_big.shape == (200, OUT_F)
    assert jnp.allclose(out_big, _reference_forward(x_big, params),
                        atol=1e-5, rtol=1e-5)

    print("KERNEL_OK")
</pallas_src>

<mosaic_0001>
module attributes {stable_mosaic.version = 11 : i64} {
  func.func @_mlp_kernel(%arg0: i32, %arg1: memref<8x24xf32, #tpu.memory_space<vmem>>, %arg2: memref<24x128xf32, #tpu.memory_space<vmem>>, %arg3: memref<1x128xf32, #tpu.memory_space<vmem>>, %arg4: memref<128x128xf32, #tpu.memory_space<vmem>>, %arg5: memref<1x128xf32, #tpu.memory_space<vmem>>, %arg6: memref<128x12xf32, #tpu.memory_space<vmem>>, %arg7: memref<1x12xf32, #tpu.memory_space<vmem>>, %arg8: memref<8x12xf32, #tpu.memory_space<vmem>>) attributes {dimension_semantics = [#tpu.dimension_semantics<parallel>], iteration_bounds = array<i64: 1>, scalar_prefetch = 0 : i64, scratch_operands = 0 : i64, tpu.core_type = #tpu.core_type<tc>, window_params = [{transform_indices = @transform_0, window_bounds = array<i64: 8, 24>}, {pipeline_mode = #tpu.pipeline_mode<synchronous>, transform_indices = @transform_1, window_bounds = array<i64: 24, 128>}, {pipeline_mode = #tpu.pipeline_mode<synchronous>, transform_indices = @transform_2, window_bounds = array<i64: 1, 128>}, {pipeline_mode = #tpu.pipeline_mode<synchronous>, transform_indices = @transform_3, window_bounds = array<i64: 128, 128>}, {pipeline_mode = #tpu.pipeline_mode<synchronous>, transform_indices = @transform_4, window_bounds = array<i64: 1, 128>}, {pipeline_mode = #tpu.pipeline_mode<synchronous>, transform_indices = @transform_5, window_bounds = array<i64: 128, 12>}, {pipeline_mode = #tpu.pipeline_mode<synchronous>, transform_indices = @transform_6, window_bounds = array<i64: 1, 12>}, {transform_indices = @transform_7, window_bounds = array<i64: 8, 12>}]} {
    %c0 = arith.constant 0 : index
    %c0_0 = arith.constant 0 : index
    %0 = vector.load %arg1[%c0, %c0_0] : memref<8x24xf32, #tpu.memory_space<vmem>>, vector<8x24xf32>
    %c0_1 = arith.constant 0 : index
    %c0_2 = arith.constant 0 : index
    %1 = vector.load %arg2[%c0_1, %c0_2] : memref<24x128xf32, #tpu.memory_space<vmem>>, vector<24x128xf32>
    %cst = arith.constant dense<0.000000e+00> : vector<8x128xf32>
    %2 = tpu.matmul %0, %1, %cst {dimension_numbers = #tpu.dot_dimension_numbers<[1], [0], [0], [1], [0, 0, 1, 1], [], []>} : vector<8x24xf32>, vector<24x128xf32>, vector<8x128xf32> -> vector<8x128xf32>
    %c0_3 = arith.constant 0 : index
    %c0_4 = arith.constant 0 : index
    %3 = vector.load %arg3[%c0_3, %c0_4] : memref<1x128xf32, #tpu.memory_space<vmem>>, vector<1x128xf32>
    %4 = vector.broadcast %3 : vector<1x128xf32> to vector<8x128xf32>
    %5 = arith.addf %2, %4 : vector<8x128xf32>
    %cst_5 = arith.constant 0.000000e+00 : f32
    %6 = vector.broadcast %cst_5 : f32 to vector<8x128xf32>
    %7 = arith.maximumf %5, %6 : vector<8x128xf32>
    %c0_6 = arith.constant 0 : index
    %c0_7 = arith.constant 0 : index
    %8 = vector.load %arg4[%c0_6, %c0_7] : memref<128x128xf32, #tpu.memory_space<vmem>>, vector<128x128xf32>
    %cst_8 = arith.constant dense<0.000000e+00> : vector<8x128xf32>
    %9 = tpu.matmul %7, %8, %cst_8 {dimension_numbers = #tpu.dot_dimension_numbers<[1], [0], [0], [1], [0, 0, 1, 1], [], []>} : vector<8x128xf32>, vector<128x128xf32>, vector<8x128xf32> -> vector<8x128xf32>
    %c0_9 = arith.constant 0 : index
    %c0_10 = arith.constant 0 : index
    %10 = vector.load %arg5[%c0_9, %c0_10] : memref<1x128xf32, #tpu.memory_space<vmem>>, vector<1x128xf32>
    %11 = vector.broadcast %10 : vector<1x128xf32> to vector<8x128xf32>
    %12 = arith.addf %9, %11 : vector<8x128xf32>
    %cst_11 = arith.constant 0.000000e+00 : f32
    %13 = vector.broadcast %cst_11 : f32 to vector<8x128xf32>
    %14 = arith.maximumf %12, %13 : vector<8x128xf32>
    %c0_12 = arith.constant 0 : index
    %c0_13 = arith.constant 0 : index
    %15 = vector.load %arg6[%c0_12, %c0_13] : memref<128x12xf32, #tpu.memory_space<vmem>>, vector<128x12xf32>
    %cst_14 = arith.constant dense<0.000000e+00> : vector<8x12xf32>
    %16 = tpu.matmul %14, %15, %cst_14 {dimension_numbers = #tpu.dot_dimension_numbers<[1], [0], [0], [1], [0, 0, 1, 1], [], []>} : vector<8x128xf32>, vector<128x12xf32>, vector<8x12xf32> -> vector<8x12xf32>
    %c0_15 = arith.constant 0 : index
    %c0_16 = arith.constant 0 : index
    %17 = vector.load %arg7[%c0_15, %c0_16] : memref<1x12xf32, #tpu.memory_space<vmem>>, vector<1x12xf32>
    %18 = vector.broadcast %17 : vector<1x12xf32> to vector<8x12xf32>
    %19 = arith.addf %16, %18 : vector<8x12xf32>
    %c0_17 = arith.constant 0 : index
    %c0_18 = arith.constant 0 : index
    %20 = vector.load %arg8[%c0_17, %c0_18] : memref<8x12xf32, #tpu.memory_space<vmem>>, vector<8x12xf32>
    tpu.vector_store %arg8[%c0_17, %c0_18], %19 {strides = array<i32>} : memref<8x12xf32, #tpu.memory_space<vmem>>, vector<8x12xf32>,
    return
  }
  func.func @transform_0(%arg0: i32) -> (i32, i32) {
    %c0_i32 = arith.constant 0 : i32
    %c0_i32_0 = arith.constant 0 : i32
    return %arg0, %c0_i32 : i32, i32
  }
  func.func @transform_1(%arg0: i32) -> (i32, i32) {
    %c0_i32 = arith.constant 0 : i32
    %c0_i32_0 = arith.constant 0 : i32
    %c0_i32_1 = arith.constant 0 : i32
    return %c0_i32, %c0_i32_0 : i32, i32
  }
  func.func @transform_2(%arg0: i32) -> (i32, i32) {
    %c0_i32 = arith.constant 0 : i32
    %c0_i32_0 = arith.constant 0 : i32
    %c0_i32_1 = arith.constant 0 : i32
    return %c0_i32, %c0_i32_0 : i32, i32
  }
  func.func @transform_3(%arg0: i32) -> (i32, i32) {
    %c0_i32 = arith.constant 0 : i32
    %c0_i32_0 = arith.constant 0 : i32
    %c0_i32_1 = arith.constant 0 : i32
    return %c0_i32, %c0_i32_0 : i32, i32
  }
  func.func @transform_4(%arg0: i32) -> (i32, i32) {
    %c0_i32 = arith.constant 0 : i32
    %c0_i32_0 = arith.constant 0 : i32
    %c0_i32_1 = arith.constant 0 : i32
    return %c0_i32, %c0_i32_0 : i32, i32
  }
  func.func @transform_5(%arg0: i32) -> (i32, i32) {
    %c0_i32 = arith.constant 0 : i32
    %c0_i32_0 = arith.constant 0 : i32
    %c0_i32_1 = arith.constant 0 : i32
    return %c0_i32, %c0_i32_0 : i32, i32
  }
  func.func @transform_6(%arg0: i32) -> (i32, i32) {
    %c0_i32 = arith.constant 0 : i32
    %c0_i32_0 = arith.constant 0 : i32
    %c0_i32_1 = arith.constant 0 : i32
    return %c0_i32, %c0_i32_0 : i32, i32
  }
  func.func @transform_7(%arg0: i32) -> (i32, i32) {
    %c0_i32 = arith.constant 0 : i32
    %c0_i32_0 = arith.constant 0 : i32
    return %arg0, %c0_i32 : i32, i32
  }
}

</mosaic_0001>

<bundles_post_ra>
// kernel: addition_network_forward.1
= control target key start
LH: loop header
LB: loop body
LE: loop exit
PB: predicated region body
PF: predicated region fallthrough
CT: control target
= control target key end

     0   :  { %vm34_vm0 = vcmask 195584   ;;  %vm140_vm1 = vcmask 97280   ;;  %s310_s1 = inlined_call_operand.vmem [shape: f32[24,128], index: 1, kind: input, shape index: {}]   ;;  %s311_s3 = inlined_call_operand.vmem [shape: f32[128,128], index: 3, kind: input, shape index: {}]   ;;  %s312_s0 = inlined_call_operand.vmem [shape: f32[8,24], index: 0, kind: input, shape index: {}]   ;;  %s313_s2 = inlined_call_operand.vmem [shape: f32[1,128], index: 2, kind: input, shape index: {}]   ;;  %s314_s4 = inlined_call_operand.vmem [shape: f32[1,128], index: 4, kind: input, shape index: {}]   ;;  %s315_s5 = inlined_call_operand.vmem [shape: f32[128,12], index: 5, kind: input, shape index: {}]   ;;  %s316_s6 = inlined_call_operand.vmem [shape: f32[1,12], index: 6, kind: input, shape index: {}]   ;;  %s317_s7 = inlined_call_operand.vmem [shape: f32[8,12], index: 7, kind: output, shape index: {}]  }
   0x1   :  { %v29_v0 = vld [vmem:[%s310_s1 + $0x10] sm:$0xff]  ;;  %v28_v1 = vld [vmem:[%s310_s1 + $0x8] sm:$0xff]  ;;  %v74_v2 = vld [vmem:[%s311_s3 + $0x78] sm:$0xff] }
   0x2   :  { %51 = vmatpush.msra.mxu0 %v29_v0  ;;  %v73_v3 = vld [vmem:[%s311_s3 + $0x70] sm:$0xff]  ;;  %v27_v4 = vld [vmem:[%s310_s1] sm:$0xff]  ;;  %79 = vmatpush.msra.mxu1 %v74_v2  ;;  %v72_v6 = vld [vmem:[%s311_s3 + $0x68] sm:$0xff] }
   0x3   :  { %v26_v5 = vld [vmem:[%s312_s0] sm:$0xff]  ;;  %v70_v8 = vld [vmem:[%s311_s3 + $0x58] sm:$0xff]  ;;  %v69_v9 = vld [vmem:[%s311_s3 + $0x50] sm:$0xff] }
   0x4   :  { %52 = vmatpush.msra.mxu0 %v28_v1  ;;  %80 = vmatpush.msra.mxu1 %v73_v3  ;;  %v71_v7 = vld [vmem:[%s311_s3 + $0x60] sm:$0xff]  ;;  %v68_v10 = vld [vmem:[%s311_s3 + $0x48] sm:$0xff]  ;;  %v66_v12 = vld [vmem:[%s311_s3 + $0x38] sm:$0xff] }
   0x5   :  { %v67_v11 = vld [vmem:[%s311_s3 + $0x40] sm:$0xff]  ;;  %v65_v13 = vld [vmem:[%s311_s3 + $0x30] sm:$0xff]  ;;  %v64_v14 = vld [vmem:[%s311_s3 + $0x28] sm:$0xff] }
   0x6   :  { %53 = vmatpush.msra.mxu0 %v27_v4  ;;  %81 = vmatpush.msra.mxu1 %v72_v6  ;;  %v63_v15 = vld [vmem:[%s311_s3 + $0x20] sm:$0xff]  ;;  %v62_v16 = vld [vmem:[%s311_s3 + $0x18] sm:$0xff]  ;;  %v61_v17 = vld [vmem:[%s311_s3 + $0x10] sm:$0xff] }
   0x7   :  { %146 = vmatmul.msk.f32.vlgmr.msra.gmra.mxu0 %vm34_vm0, %v26_v5  ;;  %v60_v18 = vld [vmem:[%s311_s3 + $0x8] sm:$0xff]  ;;  %v59_v19 = vld [vmem:[%s311_s3] sm:$0xff]  ;;  %v115_v20 = vld [vmem:[%s315_s5 + $0x78] sm:$0xff] }
   0x8   :  { %82 = vmatpush.msra.mxu1 %v71_v7  ;;  %v114_v21 = vld [vmem:[%s315_s5 + $0x70] sm:$0xff]  ;;  %120 = vmatpush.msra.mxu2 %v115_v20  ;;  %v113_v22 = vld [vmem:[%s315_s5 + $0x68] sm:$0xff]  ;;  %v112_v23 = vld [vmem:[%s315_s5 + $0x60] sm:$0xff] }
   0x9   :  { %v111_v24 = vld [vmem:[%s315_s5 + $0x58] sm:$0xff]  ;;  %v110_v25 = vld [vmem:[%s315_s5 + $0x50] sm:$0xff]  ;;  %v109_v26 = vld [vmem:[%s315_s5 + $0x48] sm:$0xff] }
   0xa   :  { %83 = vmatpush.msra.mxu1 %v70_v8  ;;  %121 = vmatpush.msra.mxu2 %v114_v21  ;;  %v108_v27 = vld [vmem:[%s315_s5 + $0x40] sm:$0xff]  ;;  %v107_v28 = vld [vmem:[%s315_s5 + $0x38] sm:$0xff]  ;;  %v106_v29 = vld [vmem:[%s315_s5 + $0x30] sm:$0xff] }
   0xb   :  { %v105_v30 = vld [vmem:[%s315_s5 + $0x28] sm:$0xff]  ;;  %v104_v31 = vld [vmem:[%s315_s5 + $0x20] sm:$0xff]  ;;  %v103_v32 = vld [vmem:[%s315_s5 + $0x18] sm:$0xff] }
   0xc   :  { %84 = vmatpush.msra.mxu1 %v69_v9  ;;  %122 = vmatpush.msra.mxu2 %v113_v22  ;;  %v147_v33 = vld [vmem:[%s313_s2] ss:$0 sm:$0xff]  ;;  %v102_v37 = vld [vmem:[%s315_s5 + $0x10] sm:$0xff]  ;;  %v101_v38 = vld [vmem:[%s315_s5 + $0x8] sm:$0xff] }
   0xd   :  { %v100_v39 = vld [vmem:[%s315_s5] sm:$0xff] }
   0xe   :  { %85 = vmatpush.msra.mxu1 %v68_v10  ;;  %123 = vmatpush.msra.mxu2 %v112_v23  ;;  %v148_v40 = vld [vmem:[%s314_s4] ss:$0 sm:$0xff] }
   0xf   :  { %v149_v44 = vld [vmem:[%s316_s6] ss:$0 sm:$0xff] }
  0x10   :  { %86 = vmatpush.msra.mxu1 %v67_v11  ;;  %124 = vmatpush.msra.mxu2 %v111_v24 }
  0x12   :  { %87 = vmatpush.msra.mxu1 %v66_v12  ;;  %125 = vmatpush.msra.mxu2 %v110_v25 }
  0x14   :  { %88 = vmatpush.msra.mxu1 %v65_v13  ;;  %126 = vmatpush.msra.mxu2 %v109_v26 }
  0x16   :  { %89 = vmatpush.msra.mxu1 %v64_v14  ;;  %127 = vmatpush.msra.mxu2 %v108_v27 }
  0x18   :  { %90 = vmatpush.msra.mxu1 %v63_v15  ;;  %128 = vmatpush.msra.mxu2 %v107_v28 }
  0x1a   :  { %91 = vmatpush.msra.mxu1 %v62_v16  ;;  %129 = vmatpush.msra.mxu2 %v106_v29 }
  0x1c   :  { %92 = vmatpush.msra.mxu1 %v61_v17  ;;  %130 = vmatpush.msra.mxu2 %v105_v30 }
  0x1e   :  { %93 = vmatpush.msra.mxu1 %v60_v18  ;;  %131 = vmatpush.msra.mxu2 %v104_v31 }
  0x20   :  { %94 = vmatpush.msra.mxu1 %v59_v19  ;;  %132 = vmatpush.msra.mxu2 %v103_v32 }
  0x22   :  { %133 = vmatpush.msra.mxu2 %v102_v37 }
  0x24   :  { %134 = vmatpush.msra.mxu2 %v101_v38 }
  0x26   :  { %135 = vmatpush.msra.mxu2 %v100_v39 }
  0x84   :  { %v55_v34 = vpop.f32.mrf.mxu0 }
  0x85   :  { %v56_v35 = vadd.f32 %v147_v33, %v55_v34 }
  0x87   :  { %v58_v36 = vmax.f32 %v56_v35, 0.0 }
  0x89   :  { %95 = vmatmul.f32.vlgmr.msra.gmra.mxu1 %v58_v36 }
 0x106   :  { %v96_v41 = vpop.f32.mrf.mxu1 }
 0x107   :  { %v97_v42 = vadd.f32 %v148_v40, %v96_v41 }
 0x109   :  { %v99_v43 = vmax.f32 %v97_v42, 0.0 }
 0x10b   :  { %136 = vmatmul.f32.vlgmr.msra.gmra.mxu2 %v99_v43 }
 0x18e   :  { %v137_v45 = vpop.f32.mrf.mxu2 }
 0x18f   :  { %v138_v46 = vadd.f32 %v149_v44, %v137_v45 }
 0x191   :  { %141 = vst.msk [vmem:[%s317_s7] sm:$0xff] %vm140_vm1, %v138_v46 }

</bundles_post_ra>
